<compile_context>
chip_gen: v6e
topology: v6e:2x2x1
jax: 0.10.0
libtpu: 0.0.40
codegen_flags: <defaults>
</compile_context>

<pallas_src>
import math

import jax
import jax.numpy as jnp
from jax.experimental import pallas as pl
from jax.experimental.pallas import tpu as pltpu

KERNEL_SIZE = 25  # fixed in the PyTorch module


def _avg_matrix(T, dtype=jnp.float32):
    """T x T matrix A such that (A @ x) equals the replicate-padded moving
    average (AvgPool1d kernel=25, stride=1) of the length-T series x."""
    half = (KERNEL_SIZE - 1) // 2
    t = jnp.arange(T)[:, None]                  # (T, 1) output position
    k = jnp.arange(KERNEL_SIZE)[None, :]        # (1, K) window tap
    src = jnp.clip(t - half + k, 0, T - 1)      # (T, K) clipped source index
    onehot = jax.nn.one_hot(src, T, dtype=dtype)        # (T, K, T)
    return onehot.sum(axis=1) / float(KERNEL_SIZE)      # (T, T)


def _oddlinear_kernel(x_ref, w_ref, b_ref, o_ref):
    """One channel-block per grid step, channels on the lane axis.

    x_ref : (B, T, Cblk)      unpadded input series
    w_ref : (T, out_T, Cblk)  combined per-channel weight (decomp folded in)
    b_ref : (out_T, Cblk)     combined per-channel bias (bs + bt)
    o_ref : (B, out_T, Cblk)  output
    """
    xf = x_ref[...].astype(jnp.float32)
    wf = w_ref[...].astype(jnp.float32)
    bf = b_ref[...].astype(jnp.float32)
    B, T, Cblk = xf.shape
    out_T = wf.shape[1]

    # Lane-parallel contraction over the (small) time axis on the VPU:
    #   out[b, o, c] = sum_t x[b, t, c] * w[t, o, c] + b[o, c]
    acc = jnp.zeros((B, out_T, Cblk), jnp.float32)
    for t in range(T):                          # static unroll, T is small
        acc = acc + xf[:, t, :][:, None, :] * wf[t, :, :][None, :, :]
    acc = acc + bf[None, :, :]
    o_ref[...] = acc.astype(o_ref.dtype)


def _pick_cblk(C):
    """Channel-block (lane) width: the full channel range when small, else a
    128-multiple chunk so the BlockSpec lane constraint is satisfied."""
    if C <= 1024:
        return C
    for cand in (1024, 512, 256, 128):
        if C % cand == 0:
            return cand
    return C


def oddlinear_forward(x, ws, bs, wt, bt, out_seq_len):
    """x: (B, T, N, N); ws/wt: (C, out_T, in_T); bs/bt: (C, out_T)."""
    B, T, N, _ = x.shape
    C = N * N

    # ---- fold series_decomp into the weights (once, in f32) ---------------
    A = _avg_matrix(T)                                    # (T, T) trend proj.
    S = jnp.eye(T, dtype=jnp.float32) - A                 # seasonal projector
    M = (jnp.einsum('cot,ts->cos', ws.astype(jnp.float32), S,
                    precision='highest')
         + jnp.einsum('cot,ts->cos', wt.astype(jnp.float32), A,
                      precision='highest'))               # (C, out_T, T)
    w_comb = jnp.transpose(M, (2, 1, 0))                  # (T, out_T, C)
    b_comb = jnp.transpose((bs + bt).astype(jnp.float32), (1, 0))  # (out_T, C)

    x_cl = x.reshape(B, T, C)                             # channels on lanes

    cblk = _pick_cblk(C)
    n_blocks = pl.cdiv(C, cblk)

    out = pl.pallas_call(
        _oddlinear_kernel,
        out_shape=jax.ShapeDtypeStruct((B, out_seq_len, C), x.dtype),
        grid_spec=pltpu.PrefetchScalarGridSpec(
            num_scalar_prefetch=0,
            grid=(n_blocks,),
            in_specs=[
                pl.BlockSpec((B, T, cblk), lambda c: (0, 0, c)),
                pl.BlockSpec((T, out_seq_len, cblk), lambda c: (0, 0, c)),
                pl.BlockSpec((out_seq_len, cblk), lambda c: (0, c)),
            ],
            out_specs=pl.BlockSpec((B, out_seq_len, cblk), lambda c: (0, 0, c)),
        ),
        # NOTE: at production sizes (large C / B / T), also raise
        # vmem_limit_bytes here when enlarging cblk (v7x has 64 MiB VMEM).
        compiler_params=pltpu.CompilerParams(
            dimension_semantics=("parallel",)),
    )(x_cl, w_comb, b_comb)

    # (B, out_T, C) -> (B, out_T, N, N): output is already lane-ordered by C.
    return out.reshape(B, out_seq_len, N, N)


def _reference(x, ws, bs, wt, bt, out_seq_len):
    """Pure-JAX reference of the PyTorch forward (for correctness check)."""
    B, T, N, _ = x.shape
    C = N * N
    half = (KERNEL_SIZE - 1) // 2
    xr = x.reshape(B, T, C)
    front = jnp.repeat(xr[:, :1, :], half, axis=1)
    end = jnp.repeat(xr[:, -1:, :], half, axis=1)
    xpad = jnp.concatenate([front, xr, end], axis=1)        # (B, T+K-1, C)
    trend = jnp.stack(
        [xpad[:, t:t + KERNEL_SIZE, :].mean(axis=1) for t in range(T)], axis=1)
    seasonal = xr - trend
    s = jnp.transpose(seasonal, (0, 2, 1))                  # (B, C, T)
    tr = jnp.transpose(trend, (0, 2, 1))
    so = jnp.einsum('bct,cot->bco', s, ws, precision='highest') + bs[None]
    to = jnp.einsum('bct,cot->bco', tr, wt, precision='highest') + bt[None]
    y = so + to                                             # (B, C, out_T)
    return jnp.transpose(y, (0, 2, 1)).reshape(B, out_seq_len, N, N)


if __name__ == "__main__":
    # Small shapes consistent with the module.
    B, num_nodes, in_seq_len, out_seq_len = 2, 4, 8, 8
    C = num_nodes ** 2

    key = jax.random.PRNGKey(0)
    kx, kws, kbs, kwt, kbt = jax.random.split(key, 5)

    x = jax.random.normal(kx, (B, in_seq_len, num_nodes, num_nodes),
                          dtype=jnp.float32)

    # Deterministic nn.Linear-style init: U(-1/sqrt(in), 1/sqrt(in)).
    bound = 1.0 / math.sqrt(in_seq_len)
    ws = jax.random.uniform(kws, (C, out_seq_len, in_seq_len),
                            minval=-bound, maxval=bound, dtype=jnp.float32)
    bs = jax.random.uniform(kbs, (C, out_seq_len),
                            minval=-bound, maxval=bound, dtype=jnp.float32)
    wt = jax.random.uniform(kwt, (C, out_seq_len, in_seq_len),
                            minval=-bound, maxval=bound, dtype=jnp.float32)
    bt = jax.random.uniform(kbt, (C, out_seq_len),
                            minval=-bound, maxval=bound, dtype=jnp.float32)

    y = oddlinear_forward(x, ws, bs, wt, bt, out_seq_len)
    y = jax.block_until_ready(y)

    y_ref = _reference(x, ws, bs, wt, bt, out_seq_len)
    assert y.shape == (B, out_seq_len, num_nodes, num_nodes)
    assert jnp.allclose(y, y_ref, atol=1e-4, rtol=1e-4), "mismatch vs reference"

    print("KERNEL_OK")
</pallas_src>

<mosaic_0001>
module attributes {stable_mosaic.version = 11 : i64} {
  func.func @_oddlinear_kernel(%arg0: i32, %arg1: memref<2x8x16xf32, #tpu.memory_space<vmem>>, %arg2: memref<8x8x16xf32, #tpu.memory_space<vmem>>, %arg3: memref<8x16xf32, #tpu.memory_space<vmem>>, %arg4: memref<2x8x16xf32, #tpu.memory_space<vmem>>) attributes {dimension_semantics = [#tpu.dimension_semantics<parallel>], iteration_bounds = array<i64: 1>, scalar_prefetch = 0 : i64, scratch_operands = 0 : i64, tpu.core_type = #tpu.core_type<tc>, window_params = [{transform_indices = @transform_0, window_bounds = array<i64: 2, 8, 16>}, {transform_indices = @transform_1, window_bounds = array<i64: 8, 8, 16>}, {transform_indices = @transform_2, window_bounds = array<i64: 8, 16>}, {transform_indices = @transform_3, window_bounds = array<i64: 2, 8, 16>}]} {
    %c0 = arith.constant 0 : index
    %c0_0 = arith.constant 0 : index
    %c0_1 = arith.constant 0 : index
    %0 = vector.load %arg1[%c0, %c0_0, %c0_1] : memref<2x8x16xf32, #tpu.memory_space<vmem>>, vector<2x8x16xf32>
    %c0_2 = arith.constant 0 : index
    %c0_3 = arith.constant 0 : index
    %c0_4 = arith.constant 0 : index
    %1 = vector.load %arg2[%c0_2, %c0_3, %c0_4] : memref<8x8x16xf32, #tpu.memory_space<vmem>>, vector<8x8x16xf32>
    %c0_5 = arith.constant 0 : index
    %c0_6 = arith.constant 0 : index
    %2 = vector.load %arg3[%c0_5, %c0_6] : memref<8x16xf32, #tpu.memory_space<vmem>>, vector<8x16xf32>
    %cst = arith.constant 0.000000e+00 : f32
    %3 = vector.broadcast %cst : f32 to vector<2x8x16xf32>
    %4 = vector.extract_strided_slice %0 {offsets = [0, 0, 0], sizes = [2, 1, 16], strides = [1, 1, 1]} : vector<2x8x16xf32> to vector<2x1x16xf32>
    %5 = vector.shape_cast %4 : vector<2x1x16xf32> to vector<2x16xf32>
    %6 = vector.shape_cast %5 : vector<2x16xf32> to vector<2x1x16xf32>
    %7 = vector.extract_strided_slice %1 {offsets = [0, 0, 0], sizes = [1, 8, 16], strides = [1, 1, 1]} : vector<8x8x16xf32> to vector<1x8x16xf32>
    %8 = vector.shape_cast %7 : vector<1x8x16xf32> to vector<8x16xf32>
    %9 = vector.shape_cast %8 : vector<8x16xf32> to vector<1x8x16xf32>
    %10 = vector.broadcast %6 : vector<2x1x16xf32> to vector<2x8x16xf32>
    %11 = vector.broadcast %9 : vector<1x8x16xf32> to vector<2x8x16xf32>
    %12 = arith.mulf %10, %11 : vector<2x8x16xf32>
    %13 = arith.addf %3, %12 : vector<2x8x16xf32>
    %14 = vector.extract_strided_slice %0 {offsets = [0, 1, 0], sizes = [2, 1, 16], strides = [1, 1, 1]} : vector<2x8x16xf32> to vector<2x1x16xf32>
    %15 = vector.shape_cast %14 : vector<2x1x16xf32> to vector<2x16xf32>
    %16 = vector.shape_cast %15 : vector<2x16xf32> to vector<2x1x16xf32>
    %17 = vector.extract_strided_slice %1 {offsets = [1, 0, 0], sizes = [1, 8, 16], strides = [1, 1, 1]} : vector<8x8x16xf32> to vector<1x8x16xf32>
    %18 = vector.shape_cast %17 : vector<1x8x16xf32> to vector<8x16xf32>
    %19 = vector.shape_cast %18 : vector<8x16xf32> to vector<1x8x16xf32>
    %20 = vector.broadcast %16 : vector<2x1x16xf32> to vector<2x8x16xf32>
    %21 = vector.broadcast %19 : vector<1x8x16xf32> to vector<2x8x16xf32>
    %22 = arith.mulf %20, %21 : vector<2x8x16xf32>
    %23 = arith.addf %13, %22 : vector<2x8x16xf32>
    %24 = vector.extract_strided_slice %0 {offsets = [0, 2, 0], sizes = [2, 1, 16], strides = [1, 1, 1]} : vector<2x8x16xf32> to vector<2x1x16xf32>
    %25 = vector.shape_cast %24 : vector<2x1x16xf32> to vector<2x16xf32>
    %26 = vector.shape_cast %25 : vector<2x16xf32> to vector<2x1x16xf32>
    %27 = vector.extract_strided_slice %1 {offsets = [2, 0, 0], sizes = [1, 8, 16], strides = [1, 1, 1]} : vector<8x8x16xf32> to vector<1x8x16xf32>
    %28 = vector.shape_cast %27 : vector<1x8x16xf32> to vector<8x16xf32>
    %29 = vector.shape_cast %28 : vector<8x16xf32> to vector<1x8x16xf32>
    %30 = vector.broadcast %26 : vector<2x1x16xf32> to vector<2x8x16xf32>
    %31 = vector.broadcast %29 : vector<1x8x16xf32> to vector<2x8x16xf32>
    %32 = arith.mulf %30, %31 : vector<2x8x16xf32>
    %33 = arith.addf %23, %32 : vector<2x8x16xf32>
    %34 = vector.extract_strided_slice %0 {offsets = [0, 3, 0], sizes = [2, 1, 16], strides = [1, 1, 1]} : vector<2x8x16xf32> to vector<2x1x16xf32>
    %35 = vector.shape_cast %34 : vector<2x1x16xf32> to vector<2x16xf32>
    %36 = vector.shape_cast %35 : vector<2x16xf32> to vector<2x1x16xf32>
    %37 = vector.extract_strided_slice %1 {offsets = [3, 0, 0], sizes = [1, 8, 16], strides = [1, 1, 1]} : vector<8x8x16xf32> to vector<1x8x16xf32>
    %38 = vector.shape_cast %37 : vector<1x8x16xf32> to vector<8x16xf32>
    %39 = vector.shape_cast %38 : vector<8x16xf32> to vector<1x8x16xf32>
    %40 = vector.broadcast %36 : vector<2x1x16xf32> to vector<2x8x16xf32>
    %41 = vector.broadcast %39 : vector<1x8x16xf32> to vector<2x8x16xf32>
    %42 = arith.mulf %40, %41 : vector<2x8x16xf32>
    %43 = arith.addf %33, %42 : vector<2x8x16xf32>
    %44 = vector.extract_strided_slice %0 {offsets = [0, 4, 0], sizes = [2, 1, 16], strides = [1, 1, 1]} : vector<2x8x16xf32> to vector<2x1x16xf32>
    %45 = vector.shape_cast %44 : vector<2x1x16xf32> to vector<2x16xf32>
    %46 = vector.shape_cast %45 : vector<2x16xf32> to vector<2x1x16xf32>
    %47 = vector.extract_strided_slice %1 {offsets = [4, 0, 0], sizes = [1, 8, 16], strides = [1, 1, 1]} : vector<8x8x16xf32> to vector<1x8x16xf32>
    %48 = vector.shape_cast %47 : vector<1x8x16xf32> to vector<8x16xf32>
    %49 = vector.shape_cast %48 : vector<8x16xf32> to vector<1x8x16xf32>
    %50 = vector.broadcast %46 : vector<2x1x16xf32> to vector<2x8x16xf32>
    %51 = vector.broadcast %49 : vector<1x8x16xf32> to vector<2x8x16xf32>
    %52 = arith.mulf %50, %51 : vector<2x8x16xf32>
    %53 = arith.addf %43, %52 : vector<2x8x16xf32>
    %54 = vector.extract_strided_slice %0 {offsets = [0, 5, 0], sizes = [2, 1, 16], strides = [1, 1, 1]} : vector<2x8x16xf32> to vector<2x1x16xf32>
    %55 = vector.shape_cast %54 : vector<2x1x16xf32> to vector<2x16xf32>
    %56 = vector.shape_cast %55 : vector<2x16xf32> to vector<2x1x16xf32>
    %57 = vector.extract_strided_slice %1 {offsets = [5, 0, 0], sizes = [1, 8, 16], strides = [1, 1, 1]} : vector<8x8x16xf32> to vector<1x8x16xf32>
    %58 = vector.shape_cast %57 : vector<1x8x16xf32> to vector<8x16xf32>
    %59 = vector.shape_cast %58 : vector<8x16xf32> to vector<1x8x16xf32>
    %60 = vector.broadcast %56 : vector<2x1x16xf32> to vector<2x8x16xf32>
    %61 = vector.broadcast %59 : vector<1x8x16xf32> to vector<2x8x16xf32>
    %62 = arith.mulf %60, %61 : vector<2x8x16xf32>
    %63 = arith.addf %53, %62 : vector<2x8x16xf32>
    %64 = vector.extract_strided_slice %0 {offsets = [0, 6, 0], sizes = [2, 1, 16], strides = [1, 1, 1]} : vector<2x8x16xf32> to vector<2x1x16xf32>
    %65 = vector.shape_cast %64 : vector<2x1x16xf32> to vector<2x16xf32>
    %66 = vector.shape_cast %65 : vector<2x16xf32> to vector<2x1x16xf32>
    %67 = vector.extract_strided_slice %1 {offsets = [6, 0, 0], sizes = [1, 8, 16], strides = [1, 1, 1]} : vector<8x8x16xf32> to vector<1x8x16xf32>
    %68 = vector.shape_cast %67 : vector<1x8x16xf32> to vector<8x16xf32>
    %69 = vector.shape_cast %68 : vector<8x16xf32> to vector<1x8x16xf32>
    %70 = vector.broadcast %66 : vector<2x1x16xf32> to vector<2x8x16xf32>
    %71 = vector.broadcast %69 : vector<1x8x16xf32> to vector<2x8x16xf32>
    %72 = arith.mulf %70, %71 : vector<2x8x16xf32>
    %73 = arith.addf %63, %72 : vector<2x8x16xf32>
    %74 = vector.extract_strided_slice %0 {offsets = [0, 7, 0], sizes = [2, 1, 16], strides = [1, 1, 1]} : vector<2x8x16xf32> to vector<2x1x16xf32>
    %75 = vector.shape_cast %74 : vector<2x1x16xf32> to vector<2x16xf32>
    %76 = vector.shape_cast %75 : vector<2x16xf32> to vector<2x1x16xf32>
    %77 = vector.extract_strided_slice %1 {offsets = [7, 0, 0], sizes = [1, 8, 16], strides = [1, 1, 1]} : vector<8x8x16xf32> to vector<1x8x16xf32>
    %78 = vector.shape_cast %77 : vector<1x8x16xf32> to vector<8x16xf32>
    %79 = vector.shape_cast %78 : vector<8x16xf32> to vector<1x8x16xf32>
    %80 = vector.broadcast %76 : vector<2x1x16xf32> to vector<2x8x16xf32>
    %81 = vector.broadcast %79 : vector<1x8x16xf32> to vector<2x8x16xf32>
    %82 = arith.mulf %80, %81 : vector<2x8x16xf32>
    %83 = arith.addf %73, %82 : vector<2x8x16xf32>
    %84 = vector.shape_cast %2 : vector<8x16xf32> to vector<1x8x16xf32>
    %85 = vector.broadcast %84 : vector<1x8x16xf32> to vector<2x8x16xf32>
    %86 = arith.addf %83, %85 : vector<2x8x16xf32>
    %c0_7 = arith.constant 0 : index
    %c0_8 = arith.constant 0 : index
    %c0_9 = arith.constant 0 : index
    %87 = vector.load %arg4[%c0_7, %c0_8, %c0_9] : memref<2x8x16xf32, #tpu.memory_space<vmem>>, vector<2x8x16xf32>
    tpu.vector_store %arg4[%c0_7, %c0_8, %c0_9], %86 {strides = array<i32>} : memref<2x8x16xf32, #tpu.memory_space<vmem>>, vector<2x8x16xf32>,
    return
  }
  func.func @transform_0(%arg0: i32) -> (i32, i32, i32) {
    %c0_i32 = arith.constant 0 : i32
    %c0_i32_0 = arith.constant 0 : i32
    %c0_i32_1 = arith.constant 0 : i32
    return %c0_i32, %c0_i32_0, %arg0 : i32, i32, i32
  }
  func.func @transform_1(%arg0: i32) -> (i32, i32, i32) {
    %c0_i32 = arith.constant 0 : i32
    %c0_i32_0 = arith.constant 0 : i32
    %c0_i32_1 = arith.constant 0 : i32
    return %c0_i32, %c0_i32_0, %arg0 : i32, i32, i32
  }
  func.func @transform_2(%arg0: i32) -> (i32, i32) {
    %c0_i32 = arith.constant 0 : i32
    %c0_i32_0 = arith.constant 0 : i32
    return %c0_i32, %arg0 : i32, i32
  }
  func.func @transform_3(%arg0: i32) -> (i32, i32, i32) {
    %c0_i32 = arith.constant 0 : i32
    %c0_i32_0 = arith.constant 0 : i32
    %c0_i32_1 = arith.constant 0 : i32
    return %c0_i32, %c0_i32_0, %arg0 : i32, i32, i32
  }
}

</mosaic_0001>

<bundles_post_ra>
// kernel: tpu_custom_call.1
= control target key start
LH: loop header
LB: loop body
LE: loop exit
PB: predicated region body
PF: predicated region fallthrough
CT: control target
= control target key end

     0   :  { %8 = vsyncpa [#allocation3], 0  ;;  %s323_s0 = inlined_call_operand.hbm [shape: f32[2,8,16], index: 0, kind: input, shape index: {}]   ;;  %s324_s1 = inlined_call_operand.hbm [shape: f32[8,8,16], index: 1, kind: input, shape index: {}]   ;;  %s325_s2 = inlined_call_operand.hbm [shape: f32[8,16], index: 2, kind: input, shape index: {}]   ;;  %s326_s3 = inlined_call_operand.hbm [shape: f32[2,8,16], index: 3, kind: output, shape index: {}]  }
   0x1   :  { %9 = vsyncpa [#allocation6], 0 }
   0x2   :  { %10 = vsyncpa [#allocation4], 0  ;;  %s276_s12 = smov [#allocation5]   ;;  %s277_s14 = smov [#allocation2]  }
   0x3   :  { %s28_s13 = sshll.u32 %s276_s12, 4  ;;  %s16_s15 = sshll.u32 %s277_s14, 4  ;;  %s29_s13 = int_to_ptr.vmem [resolvable:$true] %s28_s13  ;;  %s17_s15 = int_to_ptr.vmem [resolvable:$true] %s16_s15 }
   0x4   :  { %s198_s16 = scalar_lea.vmem %s29_s13, 1024  ;;  %p203_p1 = scmp.lt.s32.totalorder %s29_s13, %s29_s13 }
   0x5   :  { %p199_p0 = scmp.ne.s32.totalorder %s29_s13, %s198_s16  ;;  %p204_p2 = scmp.lt.s32.totalorder %s198_s16, %s198_s16 }
   0x7   :  { %p205_p3 = por %p204_p2, %p203_p1 }
   0x9   :  { %p206_p4 = pnand %p205_p3, %p199_p0 }
   0xb   :  { %209 = shalt.err (!%p206_p4)
}
   0xc   :  { %s278_s17 = smov 128   ;;  %s279_s18 = smov 8  }
   0xd   :  { %34 = dma.hbm_to_vmem [thread:$0]  %s324_s1, 1024, %s29_s13, [#allocation6], %s278_s17, %s278_s17, %s279_s18  }
   0xe   :  { %s218_s21 = scalar_lea.vmem %s17_s15, 256  ;;  %p223_p6 = scmp.lt.s32.totalorder %s17_s15, %s17_s15 }
   0xf   :  { %p219_p5 = scmp.ne.s32.totalorder %s17_s15, %s218_s21  ;;  %p224_p7 = scmp.lt.s32.totalorder %s218_s21, %s218_s21 }
  0x11   :  { %p225_p8 = por %p224_p7, %p223_p6 }
  0x13   :  { %p226_p9 = pnand %p225_p8, %p219_p5 }
  0x15   :  { %229 = shalt.err (!%p226_p9)
}
  0x16   :  { %22 = dma.hbm_to_vmem [thread:$0]  %s323_s0, 256, %s17_s15, [#allocation3], %s278_s17, %s278_s17, %s279_s18  }
  0x17   :  { %s280_s24 = smov [#allocation7]  }
  0x18   :  { %s41_s25 = sshll.u32 %s280_s24, 4  ;;  %s42_s25 = int_to_ptr.vmem [resolvable:$true] %s41_s25 }
  0x19   :  { %s238_s26 = scalar_lea.vmem %s42_s25, 128  ;;  %p243_p11 = scmp.lt.s32.totalorder %s42_s25, %s42_s25 }
  0x1a   :  { %p239_p10 = scmp.ne.s32.totalorder %s42_s25, %s238_s26  ;;  %p244_p12 = scmp.lt.s32.totalorder %s238_s26, %s238_s26 }
  0x1c   :  { %p245_p13 = por %p244_p12, %p243_p11 }
  0x1e   :  { %p246_p0 = pnand %p245_p13, %p239_p10 }
  0x20   :  { %249 = shalt.err (!%p246_p0)
}
  0x21   :  { %44 = dma.hbm_to_vmem [thread:$0]  %s325_s2, 128, %s42_s25, [#allocation6]  }
  0x22   :  { %270 = dma.done.wait [#allocation3], 256  }
  0x23   :  { %271 = vsyncadd [#allocation3], 4294967040 }
  0x24   :  { %272 = dma.done.wait [#allocation6], 1152  }
  0x25   :  { %273 = vsyncadd [#allocation6], 4294966144  ;;  %v65_v0 = vlaneseq  ;;  %v54_v7 = vld [vmem:[#allocation2] sm:$0xff]  ;;  %v56_v8 = vld [vmem:[#allocation5] sm:$0xff]  ;;  %vm163_vm0 = vcmask 130048   ;;  %s281_s0 = smov [#allocation8]  }
  0x26   :  { %v57_v9 = vld [vmem:[#allocation5 + $0x8] sm:$0xff]  ;;  %v58_v11 = vld [vmem:[#allocation5 + $0x10] sm:$0xff]  ;;  %v59_v12 = vld [vmem:[#allocation5 + $0x18] sm:$0xff]  ;;  %s171_s2 = sshll.u32 %s281_s0, 4  ;;  %s172_s2 = int_to_ptr.vmem [resolvable:$true] %s171_s2 }
  0x27   :  { %v66_v1 = vshrl.u32 %v65_v0, 7  ;;  %v60_v19 = vld [vmem:[#allocation5 + $0x20] sm:$0xff]  ;;  %v55_v23 = vld [vmem:[#allocation2 + $0x8] sm:$0xff]  ;;  %v61_v27 = vld [vmem:[#allocation5 + $0x28] sm:$0xff]  ;;  %s250_s28 = scalar_lea.vmem %s172_s2, 256  ;;  %p255_p2 = scmp.lt.s32.totalorder %s172_s2, %s172_s2 }
  0x28   :  { %v62_v36 = vld [vmem:[#allocation5 + $0x30] sm:$0xff]  ;;  %v63_v43 = vld [vmem:[#allocation5 + $0x38] sm:$0xff]  ;;  %v64_v61 = vld [vmem:[#allocation7] sm:$0xff]  ;;  %p251_p1 = scmp.ne.s32.totalorder %s172_s2, %s250_s28  ;;  %p256_p3 = scmp.lt.s32.totalorder %s250_s28, %s250_s28 }
  0x29   :  { %v67_v2 = vsub.s32 0, %v66_v1  ;;  %v79_v3 = vsub.s32 1, %v66_v1  ;;  %v91_v4 = vsub.s32 2, %v66_v1  ;;  %v103_v5 = vsub.s32 3, %v66_v1 }
  0x2a   :  { %v115_v6 = vsub.s32 4, %v66_v1  ;;  %v127_v10 = vsub.s32 5, %v66_v1  ;;  %v139_v18 = vsub.s32 6, %v66_v1  ;;  %v151_v26 = vsub.s32 7, %v66_v1  ;;  %p257_p4 = por %p256_p3, %p255_p2 }
  0x2b   :  { %v68_v13 = vrot.slane %v54_v7, %v67_v2  ;;  %v80_v14 = vrot.slane %v54_v7, %v79_v3  ;;  %v92_v15 = vrot.slane %v54_v7, %v91_v4  ;;  %v104_v16 = vrot.slane %v54_v7, %v103_v5 }
  0x2c   :  { %v116_v17 = vrot.slane %v54_v7, %v115_v6  ;;  %v128_v25 = vrot.slane %v54_v7, %v127_v10  ;;  %v72_v29 = vrot.slane %v55_v23, %v67_v2  ;;  %v84_v30 = vrot.slane %v55_v23, %v79_v3  ;;  %p258_p5 = pnand %p257_p4, %p251_p1 }
  0x2d   :  { %v73_v20 = vmul.f32 %v68_v13, %v56_v8  ;;  %v85_v21 = vmul.f32 %v80_v14, %v57_v9  ;;  %v97_v22 = vmul.f32 %v92_v15, %v58_v11  ;;  %v109_v24 = vmul.f32 %v104_v16, %v59_v12 }
  0x2e   :  { %v96_v31 = vrot.slane %v55_v23, %v91_v4  ;;  %v121_v32 = vmul.f32 %v116_v17, %v60_v19  ;;  %v140_v33 = vrot.slane %v54_v7, %v139_v18  ;;  %v108_v34 = vrot.slane %v55_v23, %v103_v5 }
  0x2f   :  { %v87_v28 = vadd.f32 %v85_v21, %v73_v20  ;;  %v120_v35 = vrot.slane %v55_v23, %v115_v6  ;;  %v74_v38 = vmul.f32 %v72_v29, %v56_v8  ;;  %v86_v39 = vmul.f32 %v84_v30, %v57_v9 }
  0x30   :  { %v98_v40 = vmul.f32 %v96_v31, %v58_v11  ;;  %v133_v41 = vmul.f32 %v128_v25, %v61_v27  ;;  %v152_v42 = vrot.slane %v54_v7, %v151_v26  ;;  %v110_v46 = vmul.f32 %v108_v34, %v59_v12 }
  0x31   :  { %v99_v37 = vadd.f32 %v97_v22, %v87_v28  ;;  %v88_v45 = vadd.f32 %v86_v39, %v74_v38  ;;  %v132_v47 = vrot.slane %v55_v23, %v127_v10  ;;  %v145_v48 = vmul.f32 %v140_v33, %v62_v36 }
  0x32   :  { %v122_v51 = vmul.f32 %v120_v35, %v60_v19  ;;  %v144_v52 = vrot.slane %v55_v23, %v139_v18  ;;  %v157_v53 = vmul.f32 %v152_v42, %v63_v43  ;;  %v156_v57 = vrot.slane %v55_v23, %v151_v26 }
  0x33   :  { %v111_v44 = vadd.f32 %v109_v24, %v99_v37  ;;  %v100_v50 = vadd.f32 %v98_v40, %v88_v45  ;;  %v134_v56 = vmul.f32 %v132_v47, %v61_v27 }
  0x34   :  { %v146_v60 = vmul.f32 %v144_v52, %v62_v36  ;;  %v158_v0 = vmul.f32 %v156_v57, %v63_v43 }
  0x35   :  { %v123_v49 = vadd.f32 %v121_v32, %v111_v44  ;;  %v112_v55 = vadd.f32 %v110_v46, %v100_v50 }
  0x37   :  { %v135_v54 = vadd.f32 %v133_v41, %v123_v49  ;;  %v124_v59 = vadd.f32 %v122_v51, %v112_v55 }
  0x39   :  { %v147_v58 = vadd.f32 %v145_v48, %v135_v54  ;;  %v136_v63 = vadd.f32 %v134_v56, %v124_v59 }
  0x3b   :  { %v159_v62 = vadd.f32 %v157_v53, %v147_v58  ;;  %v148_v2 = vadd.f32 %v146_v60, %v136_v63 }
  0x3d   :  { %v161_v1 = vadd.f32 %v159_v62, %v64_v61  ;;  %v160_v3 = vadd.f32 %v158_v0, %v148_v2 }
  0x3f   :  { %164 = vst.msk [vmem:[#allocation8] sm:$0xff] %vm163_vm0, %v161_v1  ;;  %v162_v4 = vadd.f32 %v160_v3, %v64_v61 }
  0x41   :  { %165 = vst.msk [vmem:[#allocation8 + $0x8] sm:$0xff] %vm163_vm0, %v162_v4 }
  0x42   :  { %261 = shalt.err (!%p258_p5)
}
  0x43   :  { %177 = dma.vmem_to_hbm [thread:$0]  %s172_s2, 256, %s326_s3, [#allocation4], %s278_s17, %s278_s17, %s279_s18  }
  0x44   :  { %274 = dma.done.wait [#allocation4], 256  }
  0x45   :  { %275 = vsyncadd [#allocation4], 4294967040 }
  0x46   :  { %181 = vsyncpa [#allocation3], 1 }
  0x47   :  { %182 = vsyncpa [#allocation6], 1 }
  0x48   :  { %183 = vsyncpa [#allocation4], 1 }

</bundles_post_ra>
